<compile_context>
chip_gen: v5e
topology: v5e:2x2
jax: 0.10.0
libtpu: 0.0.40
codegen_flags: <defaults>
</compile_context>

<pallas_src>
from functools import partial
from typing import NamedTuple

import jax
import jax.numpy as jnp
from jax import lax
from jax.experimental import pallas as pl
from jax.experimental.pallas import tpu as pltpu


def _round_up(x, m):
    return (x + m - 1) // m * m


class Dims(NamedTuple):
    E: int
    H: int
    O: int
    Ep: int
    Hp: int
    Op: int


def decoder_rnn_kernel(emb_ref, h0_ref, wih_ref, whh_ref, bias_ref,
                       wout_ref, bout_ref, logits_ref, hn_ref, hist_scr):
    """Single-layer tanh-RNN; input/output projections hoisted out of the loop.

    emb_ref:    (S*Bp, Ep)  bf16  embedded tokens, time-major, pre-ReLU
    h0_ref:     (Bp, Hp)    f32   initial hidden state
    wih_ref:    (Ep, Hp)    bf16  input->hidden weight (transposed vs PyTorch)
    whh_ref:    (Hp, Hp)    bf16  hidden->hidden weight (transposed)
    bias_ref:   (1, Hp)     f32   b_ih + b_hh (combined)
    wout_ref:   (Hp, Op)    bf16  output Linear weight (transposed)
    bout_ref:   (1, Op)     f32
    logits_ref: (S*Bp, Op)  f32   per-step logits (output)
    hn_ref:     (Bp, Hp)    f32   final hidden state (output)
    hist_scr:   (S, Bp, Hp) f32   VMEM scratch, reused: holds the precomputed
                                  input gates, then overwritten in-place with
                                  the hidden-state history (gates[t] is dead
                                  after step t).
    """
    S, Bp, Hp = hist_scr.shape

    # (1) Hoisted input projection for ALL timesteps: one big bf16 MXU matmul.
    x = jnp.maximum(emb_ref[...], 0)                       # ReLU, bf16
    gates = jnp.dot(x, wih_ref[...], preferred_element_type=jnp.float32)
    gates = gates + bias_ref[...]                          # (S*Bp, Hp) f32
    hist_scr[...] = gates.reshape(S, Bp, Hp)

    # (2) Serial recurrence. W_hh is read from VMEM once and stays resident in
    #     vregs for the whole loop; the hidden state is carried in bf16 so the
    #     per-step chain is gates-load -> dot -> add -> tanh -> (store, cast).
    w_hh = whh_ref[...]                                    # (Hp, Hp) bf16, hoisted

    def step(t, h):
        h_new = jnp.tanh(
            hist_scr[t]
            + jnp.dot(h, w_hh, preferred_element_type=jnp.float32))
        hist_scr[t] = h_new                                # reuse the dead gate slot
        return h_new.astype(jnp.bfloat16)

    lax.fori_loop(0, S, step, h0_ref[...].astype(jnp.bfloat16), unroll=8)
    hn_ref[...] = hist_scr[S - 1]                          # full-precision last h

    # (3) Hoisted output projection: one (S*Bp, Hp) @ (Hp, Op) matmul,
    #     single contiguous lane-dense store.
    h_all = hist_scr[...].reshape(S * Bp, Hp).astype(jnp.bfloat16)
    logits_ref[...] = (
        jnp.dot(h_all, wout_ref[...], preferred_element_type=jnp.float32)
        + bout_ref[...]
    )


def _vmem_budget_bytes(S, Bp, Ep, Hp, Op):
    """Conservative VMEM estimate: double-buffered in/out operands + scratch."""
    io = (S * Bp * Ep * 2      # emb slab (bf16)
          + Bp * Hp * 4        # h0
          + Ep * Hp * 2 + Hp * Hp * 2 + Hp * Op * 2   # weights (bf16)
          + Hp * 4 + Op * 4    # biases
          + S * Bp * Op * 4    # logits out
          + Bp * Hp * 4)       # hn out
    scratch = S * Bp * Hp * 4
    budget = 2 * io + scratch + (4 << 20)   # x2: grid=(1,) specs still double-buffer
    return min(budget, 64 << 20)            # stay within v7x physical VMEM


@partial(jax.jit, static_argnames=("dims",))
def decoder_forward(prepped, inputs, hidden, *, dims):
    """JAX wrapper reproducing Decoder.forward (rnn cell, unidirectional).

    prepped: output of prepare_params() — already padded/cast to TPU layouts.
    inputs:  (B, S) int32 token ids
    hidden:  (L, B, H) — only hidden[-1] is used, matching the PyTorch code.
    Returns (output (B, S, O), hidden_state (1, B, H)).
    """
    B, S = inputs.shape
    Bp = _round_up(B, 8)
    E, H, O, Ep, Hp, Op = dims

    # Embedding gather is glue (data-dependent lookup), done time-major directly
    # from the pre-padded bf16 table; ReLU happens in-kernel.
    emb_t = prepped["embedding"][inputs.T]                  # (S, B, Ep) bf16
    if Bp != B:
        emb_t = jnp.pad(emb_t, ((0, 0), (0, Bp - B), (0, 0)))
    emb2d = emb_t.reshape(S * Bp, Ep)                       # lane-dense 2-D slab

    h0 = hidden[-1].astype(jnp.float32)
    h0 = jnp.pad(h0, ((0, Bp - B), (0, Hp - H)))

    logits2d, h_n = pl.pallas_call(
        decoder_rnn_kernel,
        grid=(1,),
        in_specs=[
            pl.BlockSpec((S * Bp, Ep), lambda i: (0, 0)),
            pl.BlockSpec((Bp, Hp), lambda i: (0, 0)),
            pl.BlockSpec((Ep, Hp), lambda i: (0, 0)),
            pl.BlockSpec((Hp, Hp), lambda i: (0, 0)),
            pl.BlockSpec((1, Hp), lambda i: (0, 0)),
            pl.BlockSpec((Hp, Op), lambda i: (0, 0)),
            pl.BlockSpec((1, Op), lambda i: (0, 0)),
        ],
        out_specs=(
            pl.BlockSpec((S * Bp, Op), lambda i: (0, 0)),
            pl.BlockSpec((Bp, Hp), lambda i: (0, 0)),
        ),
        out_shape=(
            jax.ShapeDtypeStruct((S * Bp, Op), jnp.float32),
            jax.ShapeDtypeStruct((Bp, Hp), jnp.float32),
        ),
        scratch_shapes=[
            pltpu.VMEM((S, Bp, Hp), jnp.float32),
        ],
        compiler_params=pltpu.CompilerParams(
            dimension_semantics=("arbitrary",),
            vmem_limit_bytes=_vmem_budget_bytes(S, Bp, Ep, Hp, Op)),
    )(emb2d, prepped["w_ih"], prepped["w_hh"], prepped["bias"],
      prepped["w_out"], prepped["b_out"])[0:0] if False else pl.pallas_call(
        decoder_rnn_kernel,
        grid=(1,),
        in_specs=[
            pl.BlockSpec((S * Bp, Ep), lambda i: (0, 0)),
            pl.BlockSpec((Bp, Hp), lambda i: (0, 0)),
            pl.BlockSpec((Ep, Hp), lambda i: (0, 0)),
            pl.BlockSpec((Hp, Hp), lambda i: (0, 0)),
            pl.BlockSpec((1, Hp), lambda i: (0, 0)),
            pl.BlockSpec((Hp, Op), lambda i: (0, 0)),
            pl.BlockSpec((1, Op), lambda i: (0, 0)),
        ],
        out_specs=(
            pl.BlockSpec((S * Bp, Op), lambda i: (0, 0)),
            pl.BlockSpec((Bp, Hp), lambda i: (0, 0)),
        ),
        out_shape=(
            jax.ShapeDtypeStruct((S * Bp, Op), jnp.float32),
            jax.ShapeDtypeStruct((Bp, Hp), jnp.float32),
        ),
        scratch_shapes=[
            pltpu.VMEM((S, Bp, Hp), jnp.float32),
        ],
        compiler_params=pltpu.CompilerParams(
            dimension_semantics=("arbitrary",),
            vmem_limit_bytes=_vmem_budget_bytes(S, Bp, Ep, Hp, Op)),
    )(emb2d, h0, prepped["w_ih"], prepped["w_hh"], prepped["bias"],
      prepped["w_out"], prepped["b_out"])

    # Unpad and return in PyTorch's batch_first convention (slice before the
    # transpose so the copy only touches the unpadded extent).
    output = jnp.transpose(logits2d.reshape(S, Bp, Op)[:, :B, :O], (1, 0, 2))
    hidden_state = h_n[:B, :H][None]                        # (1, B, H)
    return output, hidden_state


def init_params(key, output_size, hidden_size, embedding_size):
    """Deterministic init mirroring the PyTorch module's parameter shapes (f32)."""
    ks = jax.random.split(key, 7)
    s_rnn = 1.0 / float(hidden_size) ** 0.5   # nn.RNN init scale
    s_out = 1.0 / float(hidden_size) ** 0.5   # nn.Linear(H, O) init scale
    return dict(
        # nn.Embedding(output_size, embedding_size): N(0, 1)
        embedding=jax.random.normal(ks[0], (output_size, embedding_size), jnp.float32),
        # nn.RNN weights stored transposed as (in, out) for x @ W in the kernel
        w_ih=jax.random.uniform(ks[1], (embedding_size, hidden_size), jnp.float32, -s_rnn, s_rnn),
        w_hh=jax.random.uniform(ks[2], (hidden_size, hidden_size), jnp.float32, -s_rnn, s_rnn),
        b_ih=jax.random.uniform(ks[3], (1, hidden_size), jnp.float32, -s_rnn, s_rnn),
        b_hh=jax.random.uniform(ks[4], (1, hidden_size), jnp.float32, -s_rnn, s_rnn),
        # nn.Linear(hidden_size, output_size), also transposed
        w_out=jax.random.uniform(ks[5], (hidden_size, output_size), jnp.float32, -s_out, s_out),
        b_out=jax.random.uniform(ks[6], (1, output_size), jnp.float32, -s_out, s_out),
    )


def prepare_params(params):
    """One-time pad + cast to TPU tile layouts (run once, not per forward call)."""
    O, E = params["embedding"].shape
    H = params["w_hh"].shape[0]
    Ep, Hp, Op = _round_up(E, 128), _round_up(H, 128), _round_up(O, 128)
    prepped = dict(
        embedding=jnp.pad(params["embedding"], ((0, 0), (0, Ep - E))).astype(jnp.bfloat16),
        w_ih=jnp.pad(params["w_ih"], ((0, Ep - E), (0, Hp - H))).astype(jnp.bfloat16),
        w_hh=jnp.pad(params["w_hh"], ((0, Hp - H), (0, Hp - H))).astype(jnp.bfloat16),
        w_out=jnp.pad(params["w_out"], ((0, Hp - H), (0, Op - O))).astype(jnp.bfloat16),
        bias=jnp.pad(params["b_ih"] + params["b_hh"], ((0, 0), (0, Hp - H))).astype(jnp.float32),
        b_out=jnp.pad(params["b_out"], ((0, 0), (0, Op - O))).astype(jnp.float32),
    )
    return prepped, Dims(E=E, H=H, O=O, Ep=Ep, Hp=Hp, Op=Op)


def decoder_forward_ref(params, inputs, hidden):
    """Pure-JAX f32 reference mirroring the PyTorch forward."""
    emb = jnp.maximum(params["embedding"][inputs], 0.0)     # (B, S, E)
    h = hidden[-1]                                          # (B, H)
    bias = params["b_ih"] + params["b_hh"]
    hs = []
    for t in range(inputs.shape[1]):
        h = jnp.tanh(emb[:, t] @ params["w_ih"] + bias + h @ params["w_hh"])
        hs.append(h)
    out = jnp.stack(hs, axis=1) @ params["w_out"] + params["b_out"]
    return out, h[None]


if __name__ == "__main__":
    # Small shapes consistent with the module: seq-to-seq decoder over a sequence.
    B, S = 2, 8
    OUTPUT_SIZE, HIDDEN, EMB, NUM_LAYERS = 16, 32, 32, 1

    key = jax.random.PRNGKey(0)
    k_params, k_inputs, k_hidden = jax.random.split(key, 3)

    params = init_params(k_params, OUTPUT_SIZE, HIDDEN, EMB)
    prepped, dims = prepare_params(params)
    inputs = jax.random.randint(k_inputs, (B, S), 0, OUTPUT_SIZE, dtype=jnp.int32)
    hidden = jax.random.normal(k_hidden, (NUM_LAYERS, B, HIDDEN), jnp.float32)

    output, hidden_state = decoder_forward(prepped, inputs, hidden, dims=dims)
    jax.block_until_ready(output)
    jax.block_until_ready(hidden_state)

    assert output.shape == (B, S, OUTPUT_SIZE), output.shape
    assert hidden_state.shape == (1, B, HIDDEN), hidden_state.shape
    assert bool(jnp.all(jnp.isfinite(output)))
    assert bool(jnp.all(jnp.isfinite(hidden_state)))

    # bf16-tolerance check against an f32 pure-JAX reference.
    out_ref, hn_ref = decoder_forward_ref(params, inputs, hidden)
    assert float(jnp.max(jnp.abs(output - out_ref))) < 0.1
    assert float(jnp.max(jnp.abs(hidden_state - hn_ref))) < 0.1

    print("KERNEL_OK")
</pallas_src>

<mosaic_0001>
module attributes {stable_mosaic.version = 11 : i64} {
  func.func @decoder_rnn_kernel(%arg0: i32, %arg1: memref<64x128xbf16, #tpu.memory_space<vmem>>, %arg2: memref<8x128xf32, #tpu.memory_space<vmem>>, %arg3: memref<128x128xbf16, #tpu.memory_space<vmem>>, %arg4: memref<128x128xbf16, #tpu.memory_space<vmem>>, %arg5: memref<1x128xf32, #tpu.memory_space<vmem>>, %arg6: memref<128x128xbf16, #tpu.memory_space<vmem>>, %arg7: memref<1x128xf32, #tpu.memory_space<vmem>>, %arg8: memref<64x128xf32, #tpu.memory_space<vmem>>, %arg9: memref<8x128xf32, #tpu.memory_space<vmem>>, %arg10: memref<8x8x128xf32, #tpu.memory_space<vmem>>) attributes {dimension_semantics = [#tpu.dimension_semantics<arbitrary>], iteration_bounds = array<i64: 1>, scalar_prefetch = 0 : i64, scratch_operands = 1 : i64, tpu.core_type = #tpu.core_type<tc>, window_params = [{pipeline_mode = #tpu.pipeline_mode<synchronous>, transform_indices = @transform_0, window_bounds = array<i64: 64, 128>}, {pipeline_mode = #tpu.pipeline_mode<synchronous>, transform_indices = @transform_1, window_bounds = array<i64: 8, 128>}, {pipeline_mode = #tpu.pipeline_mode<synchronous>, transform_indices = @transform_2, window_bounds = array<i64: 128, 128>}, {pipeline_mode = #tpu.pipeline_mode<synchronous>, transform_indices = @transform_3, window_bounds = array<i64: 128, 128>}, {pipeline_mode = #tpu.pipeline_mode<synchronous>, transform_indices = @transform_4, window_bounds = array<i64: 1, 128>}, {pipeline_mode = #tpu.pipeline_mode<synchronous>, transform_indices = @transform_5, window_bounds = array<i64: 128, 128>}, {pipeline_mode = #tpu.pipeline_mode<synchronous>, transform_indices = @transform_6, window_bounds = array<i64: 1, 128>}, {pipeline_mode = #tpu.pipeline_mode<synchronous>, transform_indices = @transform_7, window_bounds = array<i64: 64, 128>}, {pipeline_mode = #tpu.pipeline_mode<synchronous>, transform_indices = @transform_8, window_bounds = array<i64: 8, 128>}]} {
    %c0 = arith.constant 0 : index
    %c0_0 = arith.constant 0 : index
    %0 = vector.load %arg1[%c0, %c0_0] : memref<64x128xbf16, #tpu.memory_space<vmem>>, vector<64x128xbf16>
    %cst = arith.constant 0.000000e+00 : bf16
    %1 = vector.broadcast %cst : bf16 to vector<64x128xbf16>
    %2 = arith.maximumf %0, %1 : vector<64x128xbf16>
    %c0_1 = arith.constant 0 : index
    %c0_2 = arith.constant 0 : index
    %3 = vector.load %arg3[%c0_1, %c0_2] : memref<128x128xbf16, #tpu.memory_space<vmem>>, vector<128x128xbf16>
    %cst_3 = arith.constant dense<0.000000e+00> : vector<64x128xf32>
    %4 = tpu.matmul %2, %3, %cst_3 {dimension_numbers = #tpu.dot_dimension_numbers<[1], [0], [0], [1], [0, 0, 1, 1], [], []>} : vector<64x128xbf16>, vector<128x128xbf16>, vector<64x128xf32> -> vector<64x128xf32>
    %c0_4 = arith.constant 0 : index
    %c0_5 = arith.constant 0 : index
    %5 = vector.load %arg5[%c0_4, %c0_5] : memref<1x128xf32, #tpu.memory_space<vmem>>, vector<1x128xf32>
    %6 = vector.broadcast %5 : vector<1x128xf32> to vector<64x128xf32>
    %7 = arith.addf %4, %6 : vector<64x128xf32>
    %8 = vector.shape_cast %7 : vector<64x128xf32> to vector<8x8x128xf32>
    %c0_6 = arith.constant 0 : index
    %c0_7 = arith.constant 0 : index
    %c0_8 = arith.constant 0 : index
    %9 = vector.load %arg10[%c0_6, %c0_7, %c0_8] : memref<8x8x128xf32, #tpu.memory_space<vmem>>, vector<8x8x128xf32>
    tpu.vector_store %arg10[%c0_6, %c0_7, %c0_8], %8 {strides = array<i32>} : memref<8x8x128xf32, #tpu.memory_space<vmem>>, vector<8x8x128xf32>,
    %c0_9 = arith.constant 0 : index
    %c0_10 = arith.constant 0 : index
    %10 = vector.load %arg4[%c0_9, %c0_10] : memref<128x128xbf16, #tpu.memory_space<vmem>>, vector<128x128xbf16>
    %c0_11 = arith.constant 0 : index
    %c0_12 = arith.constant 0 : index
    %11 = vector.load %arg2[%c0_11, %c0_12] : memref<8x128xf32, #tpu.memory_space<vmem>>, vector<8x128xf32>
    %12 = arith.truncf %11 : vector<8x128xf32> to vector<8x128xbf16>
    %c0_i32 = arith.constant 0 : i32
    %13 = arith.index_cast %c0_i32 : i32 to index
    %c0_13 = arith.constant 0 : index
    %c0_14 = arith.constant 0 : index
    %14 = vector.load %arg10[%13, %c0_13, %c0_14] : memref<8x8x128xf32, #tpu.memory_space<vmem>>, vector<1x8x128xf32>
    %15 = vector.shape_cast %14 : vector<1x8x128xf32> to vector<8x128xf32>
    %cst_15 = arith.constant dense<0.000000e+00> : vector<8x128xf32>
    %16 = tpu.matmul %12, %10, %cst_15 {dimension_numbers = #tpu.dot_dimension_numbers<[1], [0], [0], [1], [0, 0, 1, 1], [], []>} : vector<8x128xbf16>, vector<128x128xbf16>, vector<8x128xf32> -> vector<8x128xf32>
    %17 = arith.addf %15, %16 : vector<8x128xf32>
    %18 = math.tanh %17 : vector<8x128xf32>
    %19 = arith.index_cast %c0_i32 : i32 to index
    %c0_16 = arith.constant 0 : index
    %c0_17 = arith.constant 0 : index
    %20 = vector.load %arg10[%19, %c0_16, %c0_17] : memref<8x8x128xf32, #tpu.memory_space<vmem>>, vector<1x8x128xf32>
    %21 = vector.shape_cast %20 : vector<1x8x128xf32> to vector<8x128xf32>
    %22 = vector.shape_cast %18 : vector<8x128xf32> to vector<1x8x128xf32>
    tpu.vector_store %arg10[%19, %c0_16, %c0_17], %22 {strides = array<i32>} : memref<8x8x128xf32, #tpu.memory_space<vmem>>, vector<1x8x128xf32>,
    %23 = arith.truncf %18 : vector<8x128xf32> to vector<8x128xbf16>
    %c1_i32 = arith.constant 1 : i32
    %24 = arith.index_cast %c1_i32 : i32 to index
    %c0_18 = arith.constant 0 : index
    %c0_19 = arith.constant 0 : index
    %25 = vector.load %arg10[%24, %c0_18, %c0_19] : memref<8x8x128xf32, #tpu.memory_space<vmem>>, vector<1x8x128xf32>
    %26 = vector.shape_cast %25 : vector<1x8x128xf32> to vector<8x128xf32>
    %cst_20 = arith.constant dense<0.000000e+00> : vector<8x128xf32>
    %27 = tpu.matmul %23, %10, %cst_20 {dimension_numbers = #tpu.dot_dimension_numbers<[1], [0], [0], [1], [0, 0, 1, 1], [], []>} : vector<8x128xbf16>, vector<128x128xbf16>, vector<8x128xf32> -> vector<8x128xf32>
    %28 = arith.addf %26, %27 : vector<8x128xf32>
    %29 = math.tanh %28 : vector<8x128xf32>
    %30 = arith.index_cast %c1_i32 : i32 to index
    %c0_21 = arith.constant 0 : index
    %c0_22 = arith.constant 0 : index
    %31 = vector.load %arg10[%30, %c0_21, %c0_22] : memref<8x8x128xf32, #tpu.memory_space<vmem>>, vector<1x8x128xf32>
    %32 = vector.shape_cast %31 : vector<1x8x128xf32> to vector<8x128xf32>
    %33 = vector.shape_cast %29 : vector<8x128xf32> to vector<1x8x128xf32>
    tpu.vector_store %arg10[%30, %c0_21, %c0_22], %33 {strides = array<i32>} : memref<8x8x128xf32, #tpu.memory_space<vmem>>, vector<1x8x128xf32>,
    %34 = arith.truncf %29 : vector<8x128xf32> to vector<8x128xbf16>
    %c2_i32 = arith.constant 2 : i32
    %35 = arith.index_cast %c2_i32 : i32 to index
    %c0_23 = arith.constant 0 : index
    %c0_24 = arith.constant 0 : index
    %36 = vector.load %arg10[%35, %c0_23, %c0_24] : memref<8x8x128xf32, #tpu.memory_space<vmem>>, vector<1x8x128xf32>
    %37 = vector.shape_cast %36 : vector<1x8x128xf32> to vector<8x128xf32>
    %cst_25 = arith.constant dense<0.000000e+00> : vector<8x128xf32>
    %38 = tpu.matmul %34, %10, %cst_25 {dimension_numbers = #tpu.dot_dimension_numbers<[1], [0], [0], [1], [0, 0, 1, 1], [], []>} : vector<8x128xbf16>, vector<128x128xbf16>, vector<8x128xf32> -> vector<8x128xf32>
    %39 = arith.addf %37, %38 : vector<8x128xf32>
    %40 = math.tanh %39 : vector<8x128xf32>
    %41 = arith.index_cast %c2_i32 : i32 to index
    %c0_26 = arith.constant 0 : index
    %c0_27 = arith.constant 0 : index
    %42 = vector.load %arg10[%41, %c0_26, %c0_27] : memref<8x8x128xf32, #tpu.memory_space<vmem>>, vector<1x8x128xf32>
    %43 = vector.shape_cast %42 : vector<1x8x128xf32> to vector<8x128xf32>
    %44 = vector.shape_cast %40 : vector<8x128xf32> to vector<1x8x128xf32>
    tpu.vector_store %arg10[%41, %c0_26, %c0_27], %44 {strides = array<i32>} : memref<8x8x128xf32, #tpu.memory_space<vmem>>, vector<1x8x128xf32>,
    %45 = arith.truncf %40 : vector<8x128xf32> to vector<8x128xbf16>
    %c3_i32 = arith.constant 3 : i32
    %46 = arith.index_cast %c3_i32 : i32 to index
    %c0_28 = arith.constant 0 : index
    %c0_29 = arith.constant 0 : index
    %47 = vector.load %arg10[%46, %c0_28, %c0_29] : memref<8x8x128xf32, #tpu.memory_space<vmem>>, vector<1x8x128xf32>
    %48 = vector.shape_cast %47 : vector<1x8x128xf32> to vector<8x128xf32>
    %cst_30 = arith.constant dense<0.000000e+00> : vector<8x128xf32>
    %49 = tpu.matmul %45, %10, %cst_30 {dimension_numbers = #tpu.dot_dimension_numbers<[1], [0], [0], [1], [0, 0, 1, 1], [], []>} : vector<8x128xbf16>, vector<128x128xbf16>, vector<8x128xf32> -> vector<8x128xf32>
    %50 = arith.addf %48, %49 : vector<8x128xf32>
    %51 = math.tanh %50 : vector<8x128xf32>
    %52 = arith.index_cast %c3_i32 : i32 to index
    %c0_31 = arith.constant 0 : index
    %c0_32 = arith.constant 0 : index
    %53 = vector.load %arg10[%52, %c0_31, %c0_32] : memref<8x8x128xf32, #tpu.memory_space<vmem>>, vector<1x8x128xf32>
    %54 = vector.shape_cast %53 : vector<1x8x128xf32> to vector<8x128xf32>
    %55 = vector.shape_cast %51 : vector<8x128xf32> to vector<1x8x128xf32>
    tpu.vector_store %arg10[%52, %c0_31, %c0_32], %55 {strides = array<i32>} : memref<8x8x128xf32, #tpu.memory_space<vmem>>, vector<1x8x128xf32>,
    %56 = arith.truncf %51 : vector<8x128xf32> to vector<8x128xbf16>
    %c4_i32 = arith.constant 4 : i32
    %57 = arith.index_cast %c4_i32 : i32 to index
    %c0_33 = arith.constant 0 : index
    %c0_34 = arith.constant 0 : index
    %58 = vector.load %arg10[%57, %c0_33, %c0_34] : memref<8x8x128xf32, #tpu.memory_space<vmem>>, vector<1x8x128xf32>
    %59 = vector.shape_cast %58 : vector<1x8x128xf32> to vector<8x128xf32>
    %cst_35 = arith.constant dense<0.000000e+00> : vector<8x128xf32>
    %60 = tpu.matmul %56, %10, %cst_35 {dimension_numbers = #tpu.dot_dimension_numbers<[1], [0], [0], [1], [0, 0, 1, 1], [], []>} : vector<8x128xbf16>, vector<128x128xbf16>, vector<8x128xf32> -> vector<8x128xf32>
    %61 = arith.addf %59, %60 : vector<8x128xf32>
    %62 = math.tanh %61 : vector<8x128xf32>
    %63 = arith.index_cast %c4_i32 : i32 to index
    %c0_36 = arith.constant 0 : index
    %c0_37 = arith.constant 0 : index
    %64 = vector.load %arg10[%63, %c0_36, %c0_37] : memref<8x8x128xf32, #tpu.memory_space<vmem>>, vector<1x8x128xf32>
    %65 = vector.shape_cast %64 : vector<1x8x128xf32> to vector<8x128xf32>
    %66 = vector.shape_cast %62 : vector<8x128xf32> to vector<1x8x128xf32>
    tpu.vector_store %arg10[%63, %c0_36, %c0_37], %66 {strides = array<i32>} : memref<8x8x128xf32, #tpu.memory_space<vmem>>, vector<1x8x128xf32>,
    %67 = arith.truncf %62 : vector<8x128xf32> to vector<8x128xbf16>
    %c5_i32 = arith.constant 5 : i32
    %68 = arith.index_cast %c5_i32 : i32 to index
    %c0_38 = arith.constant 0 : index
    %c0_39 = arith.constant 0 : index
    %69 = vector.load %arg10[%68, %c0_38, %c0_39] : memref<8x8x128xf32, #tpu.memory_space<vmem>>, vector<1x8x128xf32>
    %70 = vector.shape_cast %69 : vector<1x8x128xf32> to vector<8x128xf32>
    %cst_40 = arith.constant dense<0.000000e+00> : vector<8x128xf32>
    %71 = tpu.matmul %67, %10, %cst_40 {dimension_numbers = #tpu.dot_dimension_numbers<[1], [0], [0], [1], [0, 0, 1, 1], [], []>} : vector<8x128xbf16>, vector<128x128xbf16>, vector<8x128xf32> -> vector<8x128xf32>
    %72 = arith.addf %70, %71 : vector<8x128xf32>
    %73 = math.tanh %72 : vector<8x128xf32>
    %74 = arith.index_cast %c5_i32 : i32 to index
    %c0_41 = arith.constant 0 : index
    %c0_42 = arith.constant 0 : index
    %75 = vector.load %arg10[%74, %c0_41, %c0_42] : memref<8x8x128xf32, #tpu.memory_space<vmem>>, vector<1x8x128xf32>
    %76 = vector.shape_cast %75 : vector<1x8x128xf32> to vector<8x128xf32>
    %77 = vector.shape_cast %73 : vector<8x128xf32> to vector<1x8x128xf32>
    tpu.vector_store %arg10[%74, %c0_41, %c0_42], %77 {strides = array<i32>} : memref<8x8x128xf32, #tpu.memory_space<vmem>>, vector<1x8x128xf32>,
    %78 = arith.truncf %73 : vector<8x128xf32> to vector<8x128xbf16>
    %c6_i32 = arith.constant 6 : i32
    %79 = arith.index_cast %c6_i32 : i32 to index
    %c0_43 = arith.constant 0 : index
    %c0_44 = arith.constant 0 : index
    %80 = vector.load %arg10[%79, %c0_43, %c0_44] : memref<8x8x128xf32, #tpu.memory_space<vmem>>, vector<1x8x128xf32>
    %81 = vector.shape_cast %80 : vector<1x8x128xf32> to vector<8x128xf32>
    %cst_45 = arith.constant dense<0.000000e+00> : vector<8x128xf32>
    %82 = tpu.matmul %78, %10, %cst_45 {dimension_numbers = #tpu.dot_dimension_numbers<[1], [0], [0], [1], [0, 0, 1, 1], [], []>} : vector<8x128xbf16>, vector<128x128xbf16>, vector<8x128xf32> -> vector<8x128xf32>
    %83 = arith.addf %81, %82 : vector<8x128xf32>
    %84 = math.tanh %83 : vector<8x128xf32>
    %85 = arith.index_cast %c6_i32 : i32 to index
    %c0_46 = arith.constant 0 : index
    %c0_47 = arith.constant 0 : index
    %86 = vector.load %arg10[%85, %c0_46, %c0_47] : memref<8x8x128xf32, #tpu.memory_space<vmem>>, vector<1x8x128xf32>
    %87 = vector.shape_cast %86 : vector<1x8x128xf32> to vector<8x128xf32>
    %88 = vector.shape_cast %84 : vector<8x128xf32> to vector<1x8x128xf32>
    tpu.vector_store %arg10[%85, %c0_46, %c0_47], %88 {strides = array<i32>} : memref<8x8x128xf32, #tpu.memory_space<vmem>>, vector<1x8x128xf32>,
    %89 = arith.truncf %84 : vector<8x128xf32> to vector<8x128xbf16>
    %c7_i32 = arith.constant 7 : i32
    %90 = arith.index_cast %c7_i32 : i32 to index
    %c0_48 = arith.constant 0 : index
    %c0_49 = arith.constant 0 : index
    %91 = vector.load %arg10[%90, %c0_48, %c0_49] : memref<8x8x128xf32, #tpu.memory_space<vmem>>, vector<1x8x128xf32>
    %92 = vector.shape_cast %91 : vector<1x8x128xf32> to vector<8x128xf32>
    %cst_50 = arith.constant dense<0.000000e+00> : vector<8x128xf32>
    %93 = tpu.matmul %89, %10, %cst_50 {dimension_numbers = #tpu.dot_dimension_numbers<[1], [0], [0], [1], [0, 0, 1, 1], [], []>} : vector<8x128xbf16>, vector<128x128xbf16>, vector<8x128xf32> -> vector<8x128xf32>
    %94 = arith.addf %92, %93 : vector<8x128xf32>
    %95 = math.tanh %94 : vector<8x128xf32>
    %96 = arith.index_cast %c7_i32 : i32 to index
    %c0_51 = arith.constant 0 : index
    %c0_52 = arith.constant 0 : index
    %97 = vector.load %arg10[%96, %c0_51, %c0_52] : memref<8x8x128xf32, #tpu.memory_space<vmem>>, vector<1x8x128xf32>
    %98 = vector.shape_cast %97 : vector<1x8x128xf32> to vector<8x128xf32>
    %99 = vector.shape_cast %95 : vector<8x128xf32> to vector<1x8x128xf32>
    tpu.vector_store %arg10[%96, %c0_51, %c0_52], %99 {strides = array<i32>} : memref<8x8x128xf32, #tpu.memory_space<vmem>>, vector<1x8x128xf32>,
    %100 = arith.truncf %95 : vector<8x128xf32> to vector<8x128xbf16>
    %c8_i32 = arith.constant 8 : i32
    %c7 = arith.constant 7 : index
    %c0_53 = arith.constant 0 : index
    %c0_54 = arith.constant 0 : index
    %101 = vector.load %arg10[%c7, %c0_53, %c0_54] : memref<8x8x128xf32, #tpu.memory_space<vmem>>, vector<1x8x128xf32>
    %102 = vector.shape_cast %101 : vector<1x8x128xf32> to vector<8x128xf32>
    %c0_55 = arith.constant 0 : index
    %c0_56 = arith.constant 0 : index
    %103 = vector.load %arg9[%c0_55, %c0_56] : memref<8x128xf32, #tpu.memory_space<vmem>>, vector<8x128xf32>
    tpu.vector_store %arg9[%c0_55, %c0_56], %102 {strides = array<i32>} : memref<8x128xf32, #tpu.memory_space<vmem>>, vector<8x128xf32>,
    %c0_57 = arith.constant 0 : index
    %c0_58 = arith.constant 0 : index
    %c0_59 = arith.constant 0 : index
    %104 = vector.load %arg10[%c0_57, %c0_58, %c0_59] : memref<8x8x128xf32, #tpu.memory_space<vmem>>, vector<8x8x128xf32>
    %105 = vector.shape_cast %104 : vector<8x8x128xf32> to vector<64x128xf32>
    %106 = arith.truncf %105 : vector<64x128xf32> to vector<64x128xbf16>
    %c0_60 = arith.constant 0 : index
    %c0_61 = arith.constant 0 : index
    %107 = vector.load %arg6[%c0_60, %c0_61] : memref<128x128xbf16, #tpu.memory_space<vmem>>, vector<128x128xbf16>
    %cst_62 = arith.constant dense<0.000000e+00> : vector<64x128xf32>
    %108 = tpu.matmul %106, %107, %cst_62 {dimension_numbers = #tpu.dot_dimension_numbers<[1], [0], [0], [1], [0, 0, 1, 1], [], []>} : vector<64x128xbf16>, vector<128x128xbf16>, vector<64x128xf32> -> vector<64x128xf32>
    %c0_63 = arith.constant 0 : index
    %c0_64 = arith.constant 0 : index
    %109 = vector.load %arg7[%c0_63, %c0_64] : memref<1x128xf32, #tpu.memory_space<vmem>>, vector<1x128xf32>
    %110 = vector.broadcast %109 : vector<1x128xf32> to vector<64x128xf32>
    %111 = arith.addf %108, %110 : vector<64x128xf32>
    %c0_65 = arith.constant 0 : index
    %c0_66 = arith.constant 0 : index
    %112 = vector.load %arg8[%c0_65, %c0_66] : memref<64x128xf32, #tpu.memory_space<vmem>>, vector<64x128xf32>
    tpu.vector_store %arg8[%c0_65, %c0_66], %111 {strides = array<i32>} : memref<64x128xf32, #tpu.memory_space<vmem>>, vector<64x128xf32>,
    return
  }
  func.func @transform_0(%arg0: i32) -> (i32, i32) {
    %c0_i32 = arith.constant 0 : i32
    %c0_i32_0 = arith.constant 0 : i32
    %c0_i32_1 = arith.constant 0 : i32
    return %c0_i32, %c0_i32_0 : i32, i32
  }
  func.func @transform_1(%arg0: i32) -> (i32, i32) {
    %c0_i32 = arith.constant 0 : i32
    %c0_i32_0 = arith.constant 0 : i32
    %c0_i32_1 = arith.constant 0 : i32
    return %c0_i32, %c0_i32_0 : i32, i32
  }
  func.func @transform_2(%arg0: i32) -> (i32, i32) {
    %c0_i32 = arith.constant 0 : i32
    %c0_i32_0 = arith.constant 0 : i32
    %c0_i32_1 = arith.constant 0 : i32
    return %c0_i32, %c0_i32_0 : i32, i32
  }
  func.func @transform_3(%arg0: i32) -> (i32, i32) {
    %c0_i32 = arith.constant 0 : i32
    %c0_i32_0 = arith.constant 0 : i32
    %c0_i32_1 = arith.constant 0 : i32
    return %c0_i32, %c0_i32_0 : i32, i32
  }
  func.func @transform_4(%arg0: i32) -> (i32, i32) {
    %c0_i32 = arith.constant 0 : i32
    %c0_i32_0 = arith.constant 0 : i32
    %c0_i32_1 = arith.constant 0 : i32
    return %c0_i32, %c0_i32_0 : i32, i32
  }
  func.func @transform_5(%arg0: i32) -> (i32, i32) {
    %c0_i32 = arith.constant 0 : i32
    %c0_i32_0 = arith.constant 0 : i32
    %c0_i32_1 = arith.constant 0 : i32
    return %c0_i32, %c0_i32_0 : i32, i32
  }
  func.func @transform_6(%arg0: i32) -> (i32, i32) {
    %c0_i32 = arith.constant 0 : i32
    %c0_i32_0 = arith.constant 0 : i32
    %c0_i32_1 = arith.constant 0 : i32
    return %c0_i32, %c0_i32_0 : i32, i32
  }
  func.func @transform_7(%arg0: i32) -> (i32, i32) {
    %c0_i32 = arith.constant 0 : i32
    %c0_i32_0 = arith.constant 0 : i32
    %c0_i32_1 = arith.constant 0 : i32
    return %c0_i32, %c0_i32_0 : i32, i32
  }
  func.func @transform_8(%arg0: i32) -> (i32, i32) {
    %c0_i32 = arith.constant 0 : i32
    %c0_i32_0 = arith.constant 0 : i32
    %c0_i32_1 = arith.constant 0 : i32
    return %c0_i32, %c0_i32_0 : i32, i32
  }
}

</mosaic_0001>

<bundles_post_ra>
// kernel: decoder_forward.1
= control target key start
LH: loop header
LB: loop body
LE: loop exit
PB: predicated region body
PF: predicated region fallthrough
CT: control target
= control target key end

     0   :  { %14 = vsyncpa [#allocation4], 0  ;;  %s707_s30 = smov [#allocation3]   ;;  %s708_s10 = smov 64   ;;  %s939_s0 = inlined_call_operand.vmem [shape: bf16[64,128], index: 0, kind: input, shape index: {}]   ;;  %s940_s1 = inlined_call_operand.vmem [shape: f32[8,128], index: 1, kind: input, shape index: {}]   ;;  %s941_s2 = inlined_call_operand.vmem [shape: bf16[128,128], index: 2, kind: input, shape index: {}]   ;;  %s942_s3 = inlined_call_operand.vmem [shape: bf16[128,128], index: 3, kind: input, shape index: {}]   ;;  %s943_s4 = inlined_call_operand.vmem [shape: f32[1,128], index: 4, kind: input, shape index: {}]   ;;  %s944_s5 = inlined_call_operand.hbm [shape: bf16[128,128], index: 5, kind: input, shape index: {}]   ;;  %s945_s6 = inlined_call_operand.vmem [shape: f32[1,128], index: 6, kind: input, shape index: {}]   ;;  %s946_s7 = inlined_call_operand.vmem [shape: f32[64,128], index: 7, kind: output, shape index: {0}]   ;;  %s947_s8 = inlined_call_operand.vmem [shape: f32[8,128], index: 8, kind: output, shape index: {1}]  }
   0x1   :  { %s29_s29 = sshll.u32 %s944_s5, 4  ;;  %s31_s9 = sshll.u32 %s707_s30, 4  ;;  %s30_s29 = int_to_ptr.hbm [resolvable:$true] %s29_s29  ;;  %s32_s9 = int_to_ptr.vmem [resolvable:$true] %s31_s9 }
   0x2   :  { %s709_s11 = smov 4  }
   0x3   :  { %37 = dma.hbm_to_vmem [thread:$0]  %s30_s29, 1024, %s32_s9, [#allocation4], %s708_s10, %s708_s10, %s709_s11  }
   0x4   :  { %705 = dma.done.wait [#allocation4], 1024  }
   0x5   :  { %706 = vsyncadd [#allocation4], 4294966272  ;;  %v624_v0 = vld [vmem:[%s941_s2 + $0x38] sm:$0xff]  ;;  %v623_v2 = vld [vmem:[%s941_s2 + $0x30] sm:$0xff] }
   0x6   :  { %v764_v1 = vld [vmem:[%s942_s3 + $0x38] sm:$0xff]  ;;  %140 = vmatpush.bf16.msra.mxu0 %v624_v0  ;;  %v773_v3 = vld [vmem:[%s942_s3 + $0x30] sm:$0xff]  ;;  %v622_v4 = vld [vmem:[%s941_s2 + $0x28] sm:$0xff] }
   0x7   :  { %244 = vmatpush.bf16.msra.mxu1 %v764_v1  ;;  %263 = vmatpush.bf16.msra.mxu3 %v764_v1  ;;  %v784_v5 = vld [vmem:[%s942_s3 + $0x28] sm:$0xff]  ;;  %v621_v6 = vld [vmem:[%s941_s2 + $0x20] sm:$0xff]  ;;  %v620_v8 = vld [vmem:[%s941_s2 + $0x18] sm:$0xff] }
   0x8   :  { %320 = vmatpush.bf16.msra.mxu2 %v764_v1  ;;  %v795_v7 = vld [vmem:[%s942_s3 + $0x20] sm:$0xff]  ;;  %v806_v9 = vld [vmem:[%s942_s3 + $0x18] sm:$0xff]  ;;  %v619_v10 = vld [vmem:[%s941_s2 + $0x10] sm:$0xff] }
   0x9   :  { %v817_v11 = vld [vmem:[%s942_s3 + $0x10] sm:$0xff]  ;;  %v642_v12 = vld [vmem:[%s939_s0] sm:$0xff]   ;;  %v618_v15 = vld [vmem:[%s941_s2 + $0x8] sm:$0xff] }
   0xa   :  { %141 = vmatpush.bf16.msra.mxu0 %v623_v2  ;;  %v643_v13 = vunpack.c.l.bf16 %v642_v12  ;;  %v644_v14 = vunpack.c.h.bf16 %v642_v12  ;;  %v831_v16 = vld [vmem:[%s942_s3 + $0x8] sm:$0xff]  ;;  %v617_v19 = vld [vmem:[%s941_s2] sm:$0xff]  ;;  %v640_v45 = vld [vmem:[#allocation3 + $0x38] sm:$0xff] }
   0xb   :  { %245 = vmatpush.bf16.msra.mxu1 %v773_v3  ;;  %264 = vmatpush.bf16.msra.mxu3 %v773_v3  ;;  %v625_v20 = vld [vmem:[%s942_s3] sm:$0xff]  ;;  %v657_v32 = vld [vmem:[%s939_s0 + $0x8] sm:$0xff]   ;;  %v639_v53 = vld [vmem:[#allocation3 + $0x30] sm:$0xff] }
   0xc   :  { %321 = vmatpush.bf16.msra.mxu2 %v773_v3  ;;  %v60_v17 = vmax.f32 %v643_v13, 0.0  ;;  %v61_v18 = vmax.f32 %v644_v14, 0.0  ;;  %v193_v21 = vld [vmem:[%s940_s1] sm:$0xff]  ;;  %v647_v33 = vunpack.c.l.bf16 %v657_v32  ;;  %v648_v34 = vunpack.c.h.bf16 %v657_v32  ;;  %v658_v54 = vld [vmem:[%s939_s0 + $0x10] sm:$0xff]   ;;  %v638_v57 = vld [vmem:[#allocation3 + $0x28] sm:$0xff] }
   0xd   :  { %v194_v23 = vpack.c.bf16 %v193_v21, %v193_v21  ;;  %v878_v24 = vld [vmem:[%s943_s4] ss:$0 sm:$0xff]  ;;  %v651_v55 = vunpack.c.l.bf16 %v658_v54  ;;  %v652_v56 = vunpack.c.h.bf16 %v658_v54  ;;  %v636_v62 = vld [vmem:[#allocation3 + $0x18] sm:$0xff]  ;;  %v635_v63 = vld [vmem:[#allocation3 + $0x10] sm:$0xff] }
   0xe   :  { %142 = vmatpush.bf16.msra.mxu0 %v622_v4  ;;  %v68_v22 = vpack.c.bf16 %v61_v18, %v60_v17  ;;  %v62_v35 = vmax.f32 %v647_v33, 0.0  ;;  %v63_v36 = vmax.f32 %v648_v34, 0.0  ;;  %v637_v61 = vld [vmem:[#allocation3 + $0x20] sm:$0xff]  ;;  %v634_v0 = vld [vmem:[#allocation3 + $0x8] sm:$0xff]  ;;  %v659_v18 = vld [vmem:[%s939_s0 + $0x18] sm:$0xff]  }
   0xf   :  { %246 = vmatpush.bf16.msra.mxu1 %v784_v5  ;;  %265 = vmatpush.bf16.msra.mxu3 %v784_v5  ;;  %v64_v58 = vmax.f32 %v651_v55, 0.0  ;;  %v65_v59 = vmax.f32 %v652_v56, 0.0  ;;  %v664_v21 = vld [vmem:[%s945_s6] ss:$0 sm:$0xff] }
  0x10   :  { %322 = vmatpush.bf16.msra.mxu2 %v784_v5  ;;  %v69_v37 = vpack.c.bf16 %v63_v36, %v62_v35 }
  0x11   :  { %v70_v60 = vpack.c.bf16 %v65_v59, %v64_v58 }
  0x12   :  { %143 = vmatpush.bf16.msra.mxu0 %v621_v6 }
  0x13   :  { %247 = vmatpush.bf16.msra.mxu1 %v795_v7  ;;  %266 = vmatpush.bf16.msra.mxu3 %v795_v7 }
  0x14   :  { %323 = vmatpush.bf16.msra.mxu2 %v795_v7 }
  0x16   :  { %144 = vmatpush.bf16.msra.mxu0 %v620_v8 }
  0x17   :  { %248 = vmatpush.bf16.msra.mxu1 %v806_v9  ;;  %267 = vmatpush.bf16.msra.mxu3 %v806_v9 }
  0x18   :  { %324 = vmatpush.bf16.msra.mxu2 %v806_v9 }
  0x1a   :  { %145 = vmatpush.bf16.msra.mxu0 %v619_v10 }
  0x1b   :  { %249 = vmatpush.bf16.msra.mxu1 %v817_v11  ;;  %268 = vmatpush.bf16.msra.mxu3 %v817_v11 }
  0x1c   :  { %325 = vmatpush.bf16.msra.mxu2 %v817_v11 }
  0x1e   :  { %146 = vmatpush.bf16.msra.mxu0 %v618_v15 }
  0x1f   :  { %250 = vmatpush.bf16.msra.mxu1 %v831_v16  ;;  %269 = vmatpush.bf16.msra.mxu3 %v831_v16 }
  0x20   :  { %326 = vmatpush.bf16.msra.mxu2 %v831_v16 }
  0x22   :  { %147 = vmatpush.bf16.msra.mxu0 %v617_v19  ;;  %v655_v19 = vunpack.c.l.bf16 %v659_v18 }
  0x23   :  { %251 = vmatpush.bf16.msra.mxu1 %v625_v20  ;;  %270 = vmatpush.bf16.msra.mxu3 %v625_v20 }
  0x24   :  { %327 = vmatpush.bf16.msra.mxu2 %v625_v20 }
  0x25   :  { %148 = vmatmul.bf16.vlgmr.msra.gmra.mxu0 %v68_v22  ;;  %v66_v22 = vmax.f32 %v655_v19, 0.0 }
  0x26   :  { %252 = vmatmul.bf16.vlgmr.msra.gmra.mxu1 %v194_v23  ;;  %358 = vmatpush.bf16.msrb.mxu0 %v764_v1 }
  0x27   :  { %301 = vmatpush.bf16.msrb.mxu1 %v764_v1  ;;  %282 = vmatpush.bf16.msrb.mxu3 %v764_v1 }
  0x28   :  { %475 = vmatpush.bf16.msrb.mxu2 %v640_v45 }
  0x2a   :  { %359 = vmatpush.bf16.msrb.mxu0 %v773_v3 }
  0x2b   :  { %302 = vmatpush.bf16.msrb.mxu1 %v773_v3  ;;  %283 = vmatpush.bf16.msrb.mxu3 %v773_v3 }
  0x2c   :  { %476 = vmatpush.bf16.msrb.mxu2 %v639_v53 }
  0x2e   :  { %360 = vmatpush.bf16.msrb.mxu0 %v784_v5 }
  0x2f   :  { %303 = vmatpush.bf16.msrb.mxu1 %v784_v5  ;;  %284 = vmatpush.bf16.msrb.mxu3 %v784_v5 }
  0x30   :  { %477 = vmatpush.bf16.msrb.mxu2 %v638_v57 }
  0x32   :  { %361 = vmatpush.bf16.msrb.mxu0 %v795_v7 }
  0x33   :  { %304 = vmatpush.bf16.msrb.mxu1 %v795_v7  ;;  %285 = vmatpush.bf16.msrb.mxu3 %v795_v7 }
  0x34   :  { %478 = vmatpush.bf16.msrb.mxu2 %v637_v61 }
  0x35   :  { %153 = vmatmul.bf16.gmra.mxu0 %v69_v37 }
  0x36   :  { %362 = vmatpush.bf16.msrb.mxu0 %v806_v9 }
  0x37   :  { %305 = vmatpush.bf16.msrb.mxu1 %v806_v9  ;;  %286 = vmatpush.bf16.msrb.mxu3 %v806_v9 }
  0x38   :  { %479 = vmatpush.bf16.msrb.mxu2 %v636_v62 }
  0x3a   :  { %363 = vmatpush.bf16.msrb.mxu0 %v817_v11 }
  0x3b   :  { %306 = vmatpush.bf16.msrb.mxu1 %v817_v11  ;;  %287 = vmatpush.bf16.msrb.mxu3 %v817_v11 }
  0x3c   :  { %480 = vmatpush.bf16.msrb.mxu2 %v635_v63 }
  0x3e   :  { %364 = vmatpush.bf16.msrb.mxu0 %v831_v16 }
  0x3f   :  { %307 = vmatpush.bf16.msrb.mxu1 %v831_v16  ;;  %288 = vmatpush.bf16.msrb.mxu3 %v831_v16 }
  0x40   :  { %481 = vmatpush.bf16.msrb.mxu2 %v634_v0 }
  0x42   :  { %365 = vmatpush.bf16.msrb.mxu0 %v625_v20 }
  0x43   :  { %308 = vmatpush.bf16.msrb.mxu1 %v625_v20  ;;  %289 = vmatpush.bf16.msrb.mxu3 %v625_v20 }
  0x45   :  { %158 = vmatmul.bf16.gmra.mxu0 %v70_v60 }
  0x47   :  { %377 = vmatpush.bf16.msra.mxu1 %v764_v1 }
  0x4b   :  { %378 = vmatpush.bf16.msra.mxu1 %v773_v3 }
  0x4f   :  { %379 = vmatpush.bf16.msra.mxu1 %v784_v5 }
  0x53   :  { %380 = vmatpush.bf16.msra.mxu1 %v795_v7 }
  0x57   :  { %381 = vmatpush.bf16.msra.mxu1 %v806_v9 }
  0x5b   :  { %382 = vmatpush.bf16.msra.mxu1 %v817_v11 }
  0x5f   :  { %383 = vmatpush.bf16.msra.mxu1 %v831_v16 }
  0x63   :  { %384 = vmatpush.bf16.msra.mxu1 %v625_v20 }
  0xa2   :  { %v149_v25 = vpop.f32.mrf.mxu0 }
  0xa3   :  { %v253_v26 = vpop.f32.mrf.mxu1  ;;  %v150_v27 = vadd.f32 %v878_v24, %v149_v25 }
  0xa5   :  { %v257_v28 = vadd.f32 %v253_v26, %v150_v27 }
  0xa7   :  { %665 = vtanh.f32 %v257_v28 }
  0xaa   :  { %v151_v38 = vpop.f32.mrf.mxu0 }
  0xab   :  { %v255_v29 = vpop.f32.mrf.mxu1  ;;  %v152_v39 = vadd.f32 %v878_v24, %v151_v38 }
  0xad   :  { %v881_v30 = vpop.eup %665 }
  0xae   :  { %v260_v31 = vpack.c.bf16 %v881_v30, %v881_v30 }
  0xb0   :  { %271 = vmatmul.bf16.vlgmr.msra.gmra.mxu3 %v260_v31 }
  0xb1   :  { %339 = vmatpush.bf16.msra.mxu3 %v764_v1  ;;  %v633_v1 = vld [vmem:[#allocation3] sm:$0xff] }
  0xb2   :  { %v154_v46 = vpop.f32.mrf.mxu0  ;;  %482 = vmatpush.bf16.msrb.mxu2 %v633_v1 }
  0xb3   :  { %v155_v47 = vadd.f32 %v878_v24, %v154_v46 }
  0xb5   :  { %340 = vmatpush.bf16.msra.mxu3 %v773_v3 }
  0xb9   :  { %341 = vmatpush.bf16.msra.mxu3 %v784_v5 }
  0xba   :  { %v156_v2 = vpop.f32.mrf.mxu0 }
  0xbb   :  { %v157_v3 = vadd.f32 %v878_v24, %v156_v2 }
  0xbd   :  { %342 = vmatpush.bf16.msra.mxu3 %v795_v7 }
  0xc1   :  { %343 = vmatpush.bf16.msra.mxu3 %v806_v9 }
  0xc5   :  { %344 = vmatpush.bf16.msra.mxu3 %v817_v11  ;;  %v159_v11 = vpop.f32.mrf.mxu0 }
  0xc6   :  { %v160_v12 = vadd.f32 %v878_v24, %v159_v11 }
  0xc9   :  { %345 = vmatpush.bf16.msra.mxu3 %v831_v16 }
  0xcd   :  { %346 = vmatpush.bf16.msra.mxu3 %v625_v20  ;;  %v656_v20 = vunpack.c.h.bf16 %v659_v18  ;;  %v161_v34 = vpop.f32.mrf.mxu0 }
  0xce   :  { %v162_v35 = vadd.f32 %v878_v24, %v161_v34 }
  0xcf   :  { %v67_v23 = vmax.f32 %v656_v20, 0.0 }
  0xd1   :  { %v71_v26 = vpack.c.bf16 %v67_v23, %v66_v22 }
  0xd3   :  { %163 = vmatmul.bf16.gmra.mxu0 %v71_v26 }
 0x133   :  { %v272_v40 = vpop.f32.mrf.mxu3 }
 0x134   :  { %v276_v41 = vadd.f32 %v272_v40, %v152_v39 }
 0x136   :  { %667 = vtanh.f32 %v276_v41 }
 0x13b   :  { %v274_v42 = vpop.f32.mrf.mxu3 }
 0x13c   :  { %v668_v43 = vpop.eup %667 }
 0x13d   :  { %v279_v44 = vpack.c.bf16 %v668_v43, %v668_v43  ;;  %v403_v9 = vpack.c.bf16 %v668_v43, %v881_v30 }
 0x13f   :  { %290 = vmatmul.bf16.vlgmr.msrb.gmra.mxu3 %v279_v44 }
 0x150   :  { %v164_v42 = vpop.f32.mrf.mxu0 }
 0x151   :  { %v165_v44 = vadd.f32 %v878_v24, %v164_v42 }
 0x158   :  { %v166_v43 = vpop.f32.mrf.mxu0 }
 0x159   :  { %v167_v54 = vadd.f32 %v878_v24, %v166_v43 }
 0x1c2   :  { %v291_v48 = vpop.f32.mrf.mxu3 }
 0x1c3   :  { %v295_v49 = vadd.f32 %v291_v48, %v155_v47 }
 0x1c5   :  { %669 = vtanh.f32 %v295_v49 }
 0x1ca   :  { %v293_v50 = vpop.f32.mrf.mxu3 }
 0x1cb   :  { %v670_v51 = vpop.eup %669 }
 0x1cc   :  { %v298_v52 = vpack.c.bf16 %v670_v51, %v670_v51 }
 0x1ce   :  { %309 = vmatmul.bf16.vlgmr.msrb.gmra.mxu1 %v298_v52 }
 0x24b   :  { %v310_v4 = vpop.f32.mrf.mxu1 }
 0x24c   :  { %v314_v5 = vadd.f32 %v310_v4, %v157_v3 }
 0x24e   :  { %671 = vtanh.f32 %v314_v5 }
 0x253   :  { %v312_v6 = vpop.f32.mrf.mxu1 }
 0x254   :  { %v672_v7 = vpop.eup %671 }
 0x255   :  { %v317_v8 = vpack.c.bf16 %v672_v7, %v672_v7  ;;  %v404_v10 = vpack.c.bf16 %v672_v7, %v670_v51 }
 0x257   :  { %328 = vmatmul.bf16.vlgmr.msra.gmra.mxu2 %v317_v8 }
 0x267   :  { %483 = vmatmul.bf16.vlgmr.msrb.gmra.mxu2 %v403_v9 }
 0x277   :  { %488 = vmatmul.bf16.gmra.mxu2 %v404_v10 }
 0x2da   :  { %v329_v13 = vpop.f32.mrf.mxu2 }
 0x2db   :  { %v333_v14 = vadd.f32 %v329_v13, %v160_v12 }
 0x2dd   :  { %673 = vtanh.f32 %v333_v14 }
 0x2e2   :  { %v331_v15 = vpop.f32.mrf.mxu2 }
 0x2e3   :  { %v674_v16 = vpop.eup %673 }
 0x2e4   :  { %v336_v17 = vpack.c.bf16 %v674_v16, %v674_v16 }
 0x2e6   :  { %347 = vmatmul.bf16.vlgmr.msra.gmra.mxu3 %v336_v17 }
 0x2ea   :  { %v484_v25 = vpop.f32.mrf.mxu2 }
 0x2eb   :  { %v485_v27 = vadd.f32 %v664_v21, %v484_v25 }
 0x2ed   :  { %504 = vst [vmem:[%s946_s7] sm:$0xff] %v485_v27 }
 0x2f2   :  { %v486_v28 = vpop.f32.mrf.mxu2 }
 0x2f3   :  { %v487_v29 = vadd.f32 %v664_v21, %v486_v28 }
 0x2f5   :  { %505 = vst [vmem:[%s946_s7 + $0x8] sm:$0xff] %v487_v29 }
 0x2fa   :  { %v489_v30 = vpop.f32.mrf.mxu2 }
 0x2fb   :  { %v490_v31 = vadd.f32 %v664_v21, %v489_v30 }
 0x2fd   :  { %506 = vst [vmem:[%s946_s7 + $0x10] sm:$0xff] %v490_v31 }
 0x302   :  { %v491_v32 = vpop.f32.mrf.mxu2 }
 0x303   :  { %v492_v33 = vadd.f32 %v664_v21, %v491_v32 }
 0x305   :  { %507 = vst [vmem:[%s946_s7 + $0x18] sm:$0xff] %v492_v33 }
 0x369   :  { %v348_v36 = vpop.f32.mrf.mxu3 }
 0x36a   :  { %v352_v37 = vadd.f32 %v348_v36, %v162_v35 }
 0x36c   :  { %675 = vtanh.f32 %v352_v37 }
 0x371   :  { %v350_v38 = vpop.f32.mrf.mxu3 }
 0x372   :  { %v676_v39 = vpop.eup %675 }
 0x373   :  { %v355_v40 = vpack.c.bf16 %v676_v39, %v676_v39  ;;  %v405_v41 = vpack.c.bf16 %v676_v39, %v674_v16 }
 0x375   :  { %366 = vmatmul.bf16.vlgmr.msrb.gmra.mxu0 %v355_v40  ;;  %493 = vmatmul.bf16.gmra.mxu2 %v405_v41 }
 0x3f2   :  { %v367_v45 = vpop.f32.mrf.mxu0 }
 0x3f3   :  { %v371_v46 = vadd.f32 %v367_v45, %v165_v44 }
 0x3f5   :  { %677 = vtanh.f32 %v371_v46 }
 0x3f8   :  { %v494_v47 = vpop.f32.mrf.mxu2 }
 0x3f9   :  { %v495_v48 = vadd.f32 %v664_v21, %v494_v47 }
 0x3fa   :  { %v369_v49 = vpop.f32.mrf.mxu0 }
 0x3fb   :  { %v678_v50 = vpop.eup %677  ;;  %508 = vst [vmem:[%s946_s7 + $0x20] sm:$0xff] %v495_v48 }
 0x3fc   :  { %v374_v51 = vpack.c.bf16 %v678_v50, %v678_v50 }
 0x3fe   :  { %385 = vmatmul.bf16.vlgmr.msra.gmra.mxu1 %v374_v51 }
 0x400   :  { %v496_v52 = vpop.f32.mrf.mxu2 }
 0x401   :  { %v497_v53 = vadd.f32 %v664_v21, %v496_v52 }
 0x403   :  { %509 = vst [vmem:[%s946_s7 + $0x28] sm:$0xff] %v497_v53 }
 0x47b   :  { %v386_v55 = vpop.f32.mrf.mxu1 }
 0x47c   :  { %v390_v56 = vadd.f32 %v386_v55, %v167_v54 }
 0x47e   :  { %679 = vtanh.f32 %v390_v56 }
 0x483   :  { %v388_v57 = vpop.f32.mrf.mxu1 }
 0x484   :  { %v680_v58 = vpop.eup %679 }
 0x485   :  { %394 = vst [vmem:[%s947_s8] sm:$0xff] %v680_v58  ;;  %v406_v59 = vpack.c.bf16 %v680_v58, %v678_v50 }
 0x487   :  { %498 = vmatmul.bf16.gmra.mxu2 %v406_v59 }
 0x50a   :  { %v499_v60 = vpop.f32.mrf.mxu2 }
 0x50b   :  { %v500_v61 = vadd.f32 %v664_v21, %v499_v60 }
 0x50d   :  { %510 = vst [vmem:[%s946_s7 + $0x30] sm:$0xff] %v500_v61 }
 0x512   :  { %v501_v62 = vpop.f32.mrf.mxu2 }
 0x513   :  { %v502_v63 = vadd.f32 %v664_v21, %v501_v62 }
 0x515   :  { %511 = vst [vmem:[%s946_s7 + $0x38] sm:$0xff] %v502_v63 }
 0x516   :  { %520 = vsyncpa [#allocation4], 1 }

</bundles_post_ra>
